<compile_context>
chip_gen: v5e
topology: v5e:2x2
jax: 0.10.0
libtpu: 0.0.40
codegen_flags: <defaults>
</compile_context>

<pallas_src>
import jax
import jax.numpy as jnp
from jax.experimental import pallas as pl
from jax.experimental.pallas import tpu as pltpu

_NEG = -1e30  # effectively -inf for padded vocab lanes (f32-safe)


def _round_up(x, m):
    return ((x + m - 1) // m) * m


def _cbow_kernel(x_ref, w1_ref, b1_ref, w2_ref, b2_ref, out_ref):
    # x_ref : (TB, Kp) compute dtype      w1_ref : (Kp, Hp) compute dtype
    # b1_ref: (1, Hp)  f32                w2_ref : (Hp, Vp) compute dtype
    # b2_ref: (1, Vp)  f32 (-1e30 pad)    out_ref: (TB, Vp) f32
    h = jnp.dot(x_ref[...], w1_ref[...], preferred_element_type=jnp.float32)
    h = jnp.maximum(h + b1_ref[...], 0.0)                     # linear1 + ReLU
    logits = jnp.dot(h.astype(w2_ref.dtype), w2_ref[...],
                     preferred_element_type=jnp.float32) + b2_ref[...]
    # log_softmax over the (padded) vocab axis; padded lanes carry a -1e30
    # bias so exp(pad - m) underflows to exactly 0 and the normalizer is exact.
    m = jnp.max(logits, axis=-1, keepdims=True)
    lse = jnp.log(jnp.sum(jnp.exp(logits - m), axis=-1, keepdims=True)) + m
    out_ref[...] = (logits - lse).astype(out_ref.dtype)


def make_cbow_forward(vocab_size, embedding_dim, context_size, hidden_dim=128,
                      compute_dtype=jnp.float32):
    """Returns forward(inputs, emb, w1, b1, w2, b2) -> (B, vocab_size) log-probs."""
    V, E, C, H = vocab_size, embedding_dim, context_size, hidden_dim
    K = C * E
    Kp = _round_up(K, 128)      # lane-dense linear1 reduction axis
    Hp = _round_up(H, 128)      # hidden axis (already 128 for this module)
    Vp = _round_up(V, 128)      # lane-dense padded vocab width
    dt_bytes = jnp.dtype(compute_dtype).itemsize
    sub = 16 if dt_bytes == 2 else 8   # sublane granularity for batch tiles

    def forward(inputs, emb, w1, b1, w2, b2):
        # inputs: (C,) or (B, C) int32 token ids
        # emb: (V, E); w1: (C*E, H); b1: (H,); w2: (H, V); b2: (V,)  [f32]
        inputs = jnp.asarray(inputs, jnp.int32)
        squeeze = inputs.ndim == 1
        if squeeze:
            inputs = inputs[None, :]
        B = inputs.shape[0]

        # Batch tile: up to 256 rows; when the batch is big enough, split into
        # >= 2 tiles so the "parallel" axis can shard across TensorCores.
        if B >= 2 * sub:
            tb = _round_up(pl.cdiv(B, 2), sub)
        else:
            tb = _round_up(B, sub)
        tb = min(tb, 256)
        Bp = _round_up(B, tb)
        nb = Bp // tb

        # Embedding gather + flatten done by XLA (cheap, fully vectorized);
        # the kernel gets a lane-padded (TB, Kp) activation block per step.
        x = jnp.take(emb.astype(jnp.float32), inputs, axis=0).reshape(B, K)
        x_p = jnp.zeros((Bp, Kp), compute_dtype).at[:B, :K].set(
            x.astype(compute_dtype))

        w1_p = jnp.zeros((Kp, Hp), compute_dtype).at[:K, :H].set(
            w1.astype(compute_dtype))
        b1_p = jnp.zeros((1, Hp), jnp.float32).at[0, :H].set(
            b1.astype(jnp.float32))
        w2_p = jnp.zeros((Hp, Vp), compute_dtype).at[:H, :V].set(
            w2.astype(compute_dtype))
        b2_p = jnp.full((1, Vp), _NEG, jnp.float32).at[0, :V].set(
            b2.astype(jnp.float32))

        grid_spec = pltpu.PrefetchScalarGridSpec(
            num_scalar_prefetch=0,
            grid=(nb,),
            in_specs=[
                pl.BlockSpec((tb, Kp), lambda i: (i, 0)),   # activations
                pl.BlockSpec((Kp, Hp), lambda i: (0, 0)),   # w1 (grid-invariant)
                pl.BlockSpec((1, Hp), lambda i: (0, 0)),    # b1
                pl.BlockSpec((Hp, Vp), lambda i: (0, 0)),   # w2
                pl.BlockSpec((1, Vp), lambda i: (0, 0)),    # b2
            ],
            out_specs=pl.BlockSpec((tb, Vp), lambda i: (i, 0)),
        )

        # Size the VMEM limit from the actual working set (double-buffered
        # blocks + f32 intermediates + headroom), not a hard-coded constant.
        block_bytes = (tb * Kp * dt_bytes + Kp * Hp * dt_bytes
                       + Hp * Vp * dt_bytes + Hp * 4 + Vp * 4
                       + tb * Vp * 4 + tb * Hp * 4)
        vmem_limit = int(min(128 * 1024 * 1024,
                             max(4 * 1024 * 1024, 4 * block_bytes)))

        cost = pl.CostEstimate(
            flops=2 * Bp * (Kp * Hp + Hp * Vp),
            transcendentals=Bp * Vp,            # exp in log_softmax
            bytes_accessed=(Bp * Kp * dt_bytes + Kp * Hp * dt_bytes
                            + Hp * Vp * dt_bytes + Hp * 4 + Vp * 4
                            + Bp * Vp * 4),
        )

        out = pl.pallas_call(
            _cbow_kernel,
            out_shape=jax.ShapeDtypeStruct((Bp, Vp), jnp.float32),
            grid_spec=grid_spec,
            compiler_params=pltpu.CompilerParams(
                dimension_semantics=("parallel",),   # batch tiles independent
                vmem_limit_bytes=vmem_limit,
            ),
            cost_estimate=cost,
        )(x_p, w1_p, b1_p, w2_p, b2_p)

        out = out[:B, :V]
        return out[0:1] if squeeze else out

    return forward


def ref_forward(inputs, emb, w1, b1, w2, b2):
    # pure-JAX reference mirroring the PyTorch module (row-wise)
    inputs = jnp.atleast_2d(inputs)
    x = emb[inputs].reshape(inputs.shape[0], -1)
    h = jnp.maximum(x @ w1 + b1, 0.0)
    logits = h @ w2 + b2
    return jax.nn.log_softmax(logits, axis=-1)


if __name__ == "__main__":
    raw_text = ('We are about to study the idea of a computational process.\n'
                'Computational processes are abstract beings that inhabit computers.\n'
                'As they evolve, processes manipulate other abstract things called data.\n'
                'The evolution of a process is directed by a pattern of rules\n'
                'called a program. People create programs to direct processes. In effect,\n'
                'we conjure the spirits of the computer with our spells.').split()
    vocab = set(raw_text)
    vocab_size = len(vocab)

    embedding_dim = 16
    context_size = 4          # e.g. CBOW with a window of 2 words on each side
    batch = 8                 # several examples per kernel call (fills MXU rows)

    key = jax.random.PRNGKey(0)
    k_emb, k_w1, k_b1, k_w2, k_b2, k_in = jax.random.split(key, 6)

    # nn.Embedding ~ N(0, 1); nn.Linear ~ U(-1/sqrt(fan_in), 1/sqrt(fan_in))
    emb = jax.random.normal(k_emb, (vocab_size, embedding_dim), jnp.float32)
    fan1 = context_size * embedding_dim
    lim1 = 1.0 / (fan1 ** 0.5)
    w1 = jax.random.uniform(k_w1, (fan1, 128), jnp.float32, -lim1, lim1)
    b1 = jax.random.uniform(k_b1, (128,), jnp.float32, -lim1, lim1)
    lim2 = 1.0 / (128.0 ** 0.5)
    w2 = jax.random.uniform(k_w2, (128, vocab_size), jnp.float32, -lim2, lim2)
    b2 = jax.random.uniform(k_b2, (vocab_size,), jnp.float32, -lim2, lim2)

    inputs = jax.random.randint(k_in, (batch, context_size), 0, vocab_size,
                                dtype=jnp.int32)

    expected = ref_forward(inputs, emb, w1, b1, w2, b2)

    # f32 path: exact fidelity to the PyTorch module's numerics.
    cbow_f32 = make_cbow_forward(vocab_size, embedding_dim, context_size)
    log_probs = jax.block_until_ready(cbow_f32(inputs, emb, w1, b1, w2, b2))
    assert log_probs.shape == (batch, vocab_size)
    assert jnp.allclose(log_probs, expected, atol=1e-4, rtol=1e-4)

    # Single-example path (matches the original nn.Module signature exactly).
    single = jax.block_until_ready(cbow_f32(inputs[0], emb, w1, b1, w2, b2))
    assert single.shape == (1, vocab_size)
    assert jnp.allclose(single, expected[0:1], atol=1e-4, rtol=1e-4)

    # bf16 MXU-operand path (perf option from the review): weights/activations
    # in bf16, accumulation + biases + log-softmax in f32.
    cbow_bf16 = make_cbow_forward(vocab_size, embedding_dim, context_size,
                                  compute_dtype=jnp.bfloat16)
    log_probs_bf16 = jax.block_until_ready(
        cbow_bf16(inputs, emb, w1, b1, w2, b2))
    assert log_probs_bf16.shape == (batch, vocab_size)
    assert jnp.allclose(log_probs_bf16, expected, atol=5e-2, rtol=5e-2)

    print("KERNEL_OK")
</pallas_src>

<mosaic_0001>
module attributes {stable_mosaic.version = 11 : i64} {
  func.func @_cbow_kernel(%arg0: i32, %arg1: memref<8x128xf32, #tpu.memory_space<vmem>>, %arg2: memref<128x128xf32, #tpu.memory_space<vmem>>, %arg3: memref<1x128xf32, #tpu.memory_space<vmem>>, %arg4: memref<128x128xf32, #tpu.memory_space<vmem>>, %arg5: memref<1x128xf32, #tpu.memory_space<vmem>>, %arg6: memref<8x128xf32, #tpu.memory_space<vmem>>) attributes {dimension_semantics = [#tpu.dimension_semantics<parallel>], iteration_bounds = array<i64: 1>, scalar_prefetch = 0 : i64, scratch_operands = 0 : i64, tpu.core_type = #tpu.core_type<tc>, window_params = [{transform_indices = @transform_0, window_bounds = array<i64: 8, 128>}, {pipeline_mode = #tpu.pipeline_mode<synchronous>, transform_indices = @transform_1, window_bounds = array<i64: 128, 128>}, {pipeline_mode = #tpu.pipeline_mode<synchronous>, transform_indices = @transform_2, window_bounds = array<i64: 1, 128>}, {pipeline_mode = #tpu.pipeline_mode<synchronous>, transform_indices = @transform_3, window_bounds = array<i64: 128, 128>}, {pipeline_mode = #tpu.pipeline_mode<synchronous>, transform_indices = @transform_4, window_bounds = array<i64: 1, 128>}, {transform_indices = @transform_5, window_bounds = array<i64: 8, 128>}]} {
    %c0 = arith.constant 0 : index
    %c0_0 = arith.constant 0 : index
    %0 = vector.load %arg1[%c0, %c0_0] : memref<8x128xf32, #tpu.memory_space<vmem>>, vector<8x128xf32>
    %c0_1 = arith.constant 0 : index
    %c0_2 = arith.constant 0 : index
    %1 = vector.load %arg2[%c0_1, %c0_2] : memref<128x128xf32, #tpu.memory_space<vmem>>, vector<128x128xf32>
    %cst = arith.constant dense<0.000000e+00> : vector<8x128xf32>
    %2 = tpu.matmul %0, %1, %cst {dimension_numbers = #tpu.dot_dimension_numbers<[1], [0], [0], [1], [0, 0, 1, 1], [], []>} : vector<8x128xf32>, vector<128x128xf32>, vector<8x128xf32> -> vector<8x128xf32>
    %c0_3 = arith.constant 0 : index
    %c0_4 = arith.constant 0 : index
    %3 = vector.load %arg3[%c0_3, %c0_4] : memref<1x128xf32, #tpu.memory_space<vmem>>, vector<1x128xf32>
    %4 = vector.broadcast %3 : vector<1x128xf32> to vector<8x128xf32>
    %5 = arith.addf %2, %4 : vector<8x128xf32>
    %cst_5 = arith.constant 0.000000e+00 : f32
    %6 = vector.broadcast %cst_5 : f32 to vector<8x128xf32>
    %7 = arith.maximumf %5, %6 : vector<8x128xf32>
    %c0_6 = arith.constant 0 : index
    %c0_7 = arith.constant 0 : index
    %8 = vector.load %arg4[%c0_6, %c0_7] : memref<128x128xf32, #tpu.memory_space<vmem>>, vector<128x128xf32>
    %cst_8 = arith.constant dense<0.000000e+00> : vector<8x128xf32>
    %9 = tpu.matmul %7, %8, %cst_8 {dimension_numbers = #tpu.dot_dimension_numbers<[1], [0], [0], [1], [0, 0, 1, 1], [], []>} : vector<8x128xf32>, vector<128x128xf32>, vector<8x128xf32> -> vector<8x128xf32>
    %c0_9 = arith.constant 0 : index
    %c0_10 = arith.constant 0 : index
    %10 = vector.load %arg5[%c0_9, %c0_10] : memref<1x128xf32, #tpu.memory_space<vmem>>, vector<1x128xf32>
    %11 = vector.broadcast %10 : vector<1x128xf32> to vector<8x128xf32>
    %12 = arith.addf %9, %11 : vector<8x128xf32>
    %cst_11 = arith.constant dense<0xFF800000> : vector<8xf32>
    %13 = vector.multi_reduction <maximumf>, %12, %cst_11 [1] : vector<8x128xf32> to vector<8xf32>
    %14 = vector.shape_cast %13 : vector<8xf32> to vector<8x1xf32>
    %15 = vector.broadcast %14 : vector<8x1xf32> to vector<8x128xf32>
    %16 = arith.subf %12, %15 : vector<8x128xf32>
    %17 = math.exp %16 : vector<8x128xf32>
    %cst_12 = arith.constant dense<0.000000e+00> : vector<8xf32>
    %18 = vector.multi_reduction <add>, %17, %cst_12 [1] : vector<8x128xf32> to vector<8xf32>
    %19 = vector.shape_cast %18 : vector<8xf32> to vector<8x1xf32>
    %20 = math.log %19 : vector<8x1xf32>
    %21 = arith.addf %20, %14 : vector<8x1xf32>
    %22 = vector.broadcast %21 : vector<8x1xf32> to vector<8x128xf32>
    %23 = arith.subf %12, %22 : vector<8x128xf32>
    %c0_13 = arith.constant 0 : index
    %c0_14 = arith.constant 0 : index
    %24 = vector.load %arg6[%c0_13, %c0_14] : memref<8x128xf32, #tpu.memory_space<vmem>>, vector<8x128xf32>
    tpu.vector_store %arg6[%c0_13, %c0_14], %23 {strides = array<i32>} : memref<8x128xf32, #tpu.memory_space<vmem>>, vector<8x128xf32>,
    return
  }
  func.func @transform_0(%arg0: i32) -> (i32, i32) {
    %c0_i32 = arith.constant 0 : i32
    %c0_i32_0 = arith.constant 0 : i32
    return %arg0, %c0_i32 : i32, i32
  }
  func.func @transform_1(%arg0: i32) -> (i32, i32) {
    %c0_i32 = arith.constant 0 : i32
    %c0_i32_0 = arith.constant 0 : i32
    %c0_i32_1 = arith.constant 0 : i32
    return %c0_i32, %c0_i32_0 : i32, i32
  }
  func.func @transform_2(%arg0: i32) -> (i32, i32) {
    %c0_i32 = arith.constant 0 : i32
    %c0_i32_0 = arith.constant 0 : i32
    %c0_i32_1 = arith.constant 0 : i32
    return %c0_i32, %c0_i32_0 : i32, i32
  }
  func.func @transform_3(%arg0: i32) -> (i32, i32) {
    %c0_i32 = arith.constant 0 : i32
    %c0_i32_0 = arith.constant 0 : i32
    %c0_i32_1 = arith.constant 0 : i32
    return %c0_i32, %c0_i32_0 : i32, i32
  }
  func.func @transform_4(%arg0: i32) -> (i32, i32) {
    %c0_i32 = arith.constant 0 : i32
    %c0_i32_0 = arith.constant 0 : i32
    %c0_i32_1 = arith.constant 0 : i32
    return %c0_i32, %c0_i32_0 : i32, i32
  }
  func.func @transform_5(%arg0: i32) -> (i32, i32) {
    %c0_i32 = arith.constant 0 : i32
    %c0_i32_0 = arith.constant 0 : i32
    return %arg0, %c0_i32 : i32, i32
  }
}

</mosaic_0001>

<bundles_post_ra>
// kernel: tpu_custom_call.1
= control target key start
LH: loop header
LB: loop body
LE: loop exit
PB: predicated region body
PF: predicated region fallthrough
CT: control target
= control target key end

     0   :  { %10 = vsyncpa [#allocation3], 0  ;;  %s346_s0 = inlined_call_operand.hbm [shape: f32[8,128], index: 0, kind: input, shape index: {}]   ;;  %s347_s1 = inlined_call_operand.hbm [shape: f32[128,128], index: 1, kind: input, shape index: {}]   ;;  %s348_s2 = inlined_call_operand.vmem [shape: f32[1,128], index: 2, kind: input, shape index: {}]   ;;  %s349_s3 = inlined_call_operand.hbm [shape: f32[128,128], index: 3, kind: input, shape index: {}]   ;;  %s350_s4 = inlined_call_operand.vmem [shape: f32[1,128], index: 4, kind: input, shape index: {}]   ;;  %s351_s5 = inlined_call_operand.hbm [shape: f32[8,128], index: 5, kind: output, shape index: {}]  }
   0x1   :  { %11 = vsyncpa [#allocation6], 0  ;;  %s28_s20 = sshll.u32 %s347_s1, 4  ;;  %s29_s20 = int_to_ptr.hbm [resolvable:$true] %s28_s20 }
   0x2   :  { %12 = vsyncpa [#allocation4], 0  ;;  %s292_s21 = smov [#allocation5]   ;;  %s18_s25 = sshll.u32 %s346_s0, 4  ;;  %s19_s25 = int_to_ptr.hbm [resolvable:$true] %s18_s25 }
   0x3   :  { %s30_s22 = sshll.u32 %s292_s21, 4  ;;  %s293_s26 = smov 128   ;;  %s31_s22 = int_to_ptr.vmem [resolvable:$true] %s30_s22 }
   0x4   :  { %s294_s27 = smov 8   ;;  %s295_s28 = smov [#allocation2]  }
   0x5   :  { %36 = dma.hbm_to_vmem [thread:$0]  %s29_s20, 2048, %s31_s22, [#allocation6], %s293_s26, %s293_s26, %s294_s27  }
   0x6   :  { %s20_s29 = sshll.u32 %s295_s28, 4  ;;  %s43_s7 = sshll.u32 %s349_s3, 4  ;;  %s21_s29 = int_to_ptr.vmem [resolvable:$true] %s20_s29  ;;  %s44_s7 = int_to_ptr.hbm [resolvable:$true] %s43_s7 }
   0x7   :  { %23 = dma.hbm_to_vmem [thread:$0]  %s19_s25, 128, %s21_s29, [#allocation3]  }
   0x8   :  { %s296_s1 = smov [#allocation7]  }
   0x9   :  { %s45_s8 = sshll.u32 %s296_s1, 4  ;;  %s46_s8 = int_to_ptr.vmem [resolvable:$true] %s45_s8 }
   0xa   :  { %51 = dma.hbm_to_vmem [thread:$0]  %s44_s7, 2048, %s46_s8, [#allocation6], %s293_s26, %s293_s26, %s294_s27  }
   0xb   :  { %286 = dma.done.wait [#allocation3], 128  }
   0xc   :  { %287 = vsyncadd [#allocation3], 4294967168 }
   0xd   :  { %288 = dma.done.wait [#allocation6], 4096  }
   0xe   :  { %289 = vsyncadd [#allocation6], 4294963200  ;;  %v82_v0 = vld [vmem:[#allocation5 + $0x78] sm:$0xff]  ;;  %v81_v1 = vld [vmem:[#allocation5 + $0x70] sm:$0xff]  ;;  %s167_s14 = sshll.u32 %s351_s5, 4  ;;  %s168_s14 = int_to_ptr.hbm [resolvable:$true] %s167_s14 }
   0xf   :  { %87 = vmatpush.msra.mxu0 %v82_v0  ;;  %v80_v2 = vld [vmem:[#allocation5 + $0x68] sm:$0xff]  ;;  %v79_v3 = vld [vmem:[#allocation5 + $0x60] sm:$0xff]  ;;  %v123_v4 = vld [vmem:[#allocation7 + $0x78] sm:$0xff] }
  0x10   :  { %v78_v5 = vld [vmem:[#allocation5 + $0x58] sm:$0xff]  ;;  %128 = vmatpush.msra.mxu1 %v123_v4  ;;  %v122_v6 = vld [vmem:[#allocation7 + $0x70] sm:$0xff]  ;;  %v121_v7 = vld [vmem:[#allocation7 + $0x68] sm:$0xff] }
  0x11   :  { %88 = vmatpush.msra.mxu0 %v81_v1  ;;  %v77_v8 = vld [vmem:[#allocation5 + $0x50] sm:$0xff]  ;;  %v120_v9 = vld [vmem:[#allocation7 + $0x60] sm:$0xff]  ;;  %v76_v10 = vld [vmem:[#allocation5 + $0x48] sm:$0xff] }
  0x12   :  { %129 = vmatpush.msra.mxu1 %v122_v6  ;;  %v119_v11 = vld [vmem:[#allocation7 + $0x58] sm:$0xff]  ;;  %v75_v12 = vld [vmem:[#allocation5 + $0x40] sm:$0xff]  ;;  %v118_v13 = vld [vmem:[#allocation7 + $0x50] sm:$0xff] }
  0x13   :  { %89 = vmatpush.msra.mxu0 %v80_v2  ;;  %v74_v14 = vld [vmem:[#allocation5 + $0x38] sm:$0xff]  ;;  %v117_v15 = vld [vmem:[#allocation7 + $0x48] sm:$0xff]  ;;  %v73_v16 = vld [vmem:[#allocation5 + $0x30] sm:$0xff] }
  0x14   :  { %130 = vmatpush.msra.mxu1 %v121_v7  ;;  %v116_v17 = vld [vmem:[#allocation7 + $0x40] sm:$0xff]  ;;  %v72_v18 = vld [vmem:[#allocation5 + $0x28] sm:$0xff]  ;;  %v115_v19 = vld [vmem:[#allocation7 + $0x38] sm:$0xff] }
  0x15   :  { %90 = vmatpush.msra.mxu0 %v79_v3  ;;  %v71_v20 = vld [vmem:[#allocation5 + $0x20] sm:$0xff]  ;;  %v114_v21 = vld [vmem:[#allocation7 + $0x30] sm:$0xff]  ;;  %v70_v22 = vld [vmem:[#allocation5 + $0x18] sm:$0xff] }
  0x16   :  { %131 = vmatpush.msra.mxu1 %v120_v9  ;;  %v113_v23 = vld [vmem:[#allocation7 + $0x28] sm:$0xff]  ;;  %v69_v24 = vld [vmem:[#allocation5 + $0x10] sm:$0xff]  ;;  %v112_v25 = vld [vmem:[#allocation7 + $0x20] sm:$0xff] }
  0x17   :  { %91 = vmatpush.msra.mxu0 %v78_v5  ;;  %v68_v26 = vld [vmem:[#allocation5 + $0x8] sm:$0xff]  ;;  %v111_v27 = vld [vmem:[#allocation7 + $0x18] sm:$0xff]  ;;  %v67_v28 = vld [vmem:[#allocation5] sm:$0xff] }
  0x18   :  { %132 = vmatpush.msra.mxu1 %v119_v11  ;;  %v66_v29 = vld [vmem:[#allocation2] sm:$0xff]  ;;  %v110_v30 = vld [vmem:[#allocation7 + $0x10] sm:$0xff]  ;;  %v109_v31 = vld [vmem:[#allocation7 + $0x8] sm:$0xff] }
  0x19   :  { %92 = vmatpush.msra.mxu0 %v77_v8  ;;  %v108_v32 = vld [vmem:[#allocation7] sm:$0xff]  ;;  %v184_v33 = vld [vmem:[%s348_s2] ss:$0 sm:$0xff]  ;;  %s297_s2 = smov [#allocation8]  }
  0x1a   :  { %133 = vmatpush.msra.mxu1 %v118_v13  ;;  %v185_v37 = vld [vmem:[%s350_s4] ss:$0 sm:$0xff]  ;;  %s165_s11 = sshll.u32 %s297_s2, 4  ;;  %s166_s11 = int_to_ptr.vmem [resolvable:$true] %s165_s11 }
  0x1b   :  { %93 = vmatpush.msra.mxu0 %v76_v10 }
  0x1c   :  { %134 = vmatpush.msra.mxu1 %v117_v15 }
  0x1d   :  { %94 = vmatpush.msra.mxu0 %v75_v12 }
  0x1e   :  { %135 = vmatpush.msra.mxu1 %v116_v17 }
  0x1f   :  { %95 = vmatpush.msra.mxu0 %v74_v14 }
  0x20   :  { %136 = vmatpush.msra.mxu1 %v115_v19 }
  0x21   :  { %96 = vmatpush.msra.mxu0 %v73_v16 }
  0x22   :  { %137 = vmatpush.msra.mxu1 %v114_v21 }
  0x23   :  { %97 = vmatpush.msra.mxu0 %v72_v18 }
  0x24   :  { %138 = vmatpush.msra.mxu1 %v113_v23 }
  0x25   :  { %98 = vmatpush.msra.mxu0 %v71_v20 }
  0x26   :  { %139 = vmatpush.msra.mxu1 %v112_v25 }
  0x27   :  { %99 = vmatpush.msra.mxu0 %v70_v22 }
  0x28   :  { %140 = vmatpush.msra.mxu1 %v111_v27 }
  0x29   :  { %100 = vmatpush.msra.mxu0 %v69_v24 }
  0x2a   :  { %141 = vmatpush.msra.mxu1 %v110_v30 }
  0x2b   :  { %101 = vmatpush.msra.mxu0 %v68_v26 }
  0x2c   :  { %142 = vmatpush.msra.mxu1 %v109_v31 }
  0x2d   :  { %102 = vmatpush.msra.mxu0 %v67_v28 }
  0x2e   :  { %103 = vmatmul.f32.vlgmr.msra.gmra.mxu0 %v66_v29  ;;  %143 = vmatpush.msra.mxu1 %v108_v32 }
  0xab   :  { %v104_v34 = vpop.f32.mrf.mxu0 }
  0xac   :  { %v105_v35 = vadd.f32 %v184_v33, %v104_v34 }
  0xae   :  { %v107_v36 = vmax.f32 %v105_v35, 0.0 }
  0xb0   :  { %144 = vmatmul.f32.vlgmr.msra.gmra.mxu1 %v107_v36 }
 0x12d   :  { %v145_v38 = vpop.f32.mrf.mxu1 }
 0x12e   :  { %v146_v39 = vadd.f32 %v185_v37, %v145_v38 }
 0x130   :  { %148 = vmax.xlane.f32.xlu0 %v146_v39 }
 0x1a3   :  { %v149_v40 = vpop.xlane.xlu0 %148 }
 0x1a4   :  { %v150_v41 = vsub.f32 %v146_v39, %v149_v40 }
 0x1a6   :  { %v151_v42 = vmul.f32 1.442695, %v150_v41 }
 0x1a8   :  { %186 = vpow2.f32 %v151_v42 }
 0x1ae   :  { %v187_v43 = vpop.eup %186 }
 0x1af   :  { %153 = vadd.xlane.f32.xlu0 %v187_v43 }
 0x222   :  { %v154_v44 = vpop.xlane.xlu0 %153 }
 0x223   :  { %188 = vlog2.f32 %v154_v44 }
 0x229   :  { %v189_v45 = vpop.eup %188 }
 0x22a   :  { %v156_v46 = vmul.f32 0.6931472, %v189_v45 }
 0x22c   :  { %v157_v47 = vadd.f32 %v156_v46, %v149_v40 }
 0x22e   :  { %v158_v48 = vsub.f32 %v146_v39, %v157_v47 }
 0x230   :  { %159 = vst [vmem:[#allocation8] sm:$0xff] %v158_v48 }
 0x231   :  { %170 = dma.vmem_to_hbm [thread:$0]  %s166_s11, 128, %s168_s14, [#allocation4]  }
 0x232   :  { %290 = dma.done.wait [#allocation4], 128  }
 0x233   :  { %291 = vsyncadd [#allocation4], 4294967168 }
 0x234   :  { %175 = vsyncpa [#allocation3], 1 }
 0x235   :  { %176 = vsyncpa [#allocation6], 1 }
 0x236   :  { %177 = vsyncpa [#allocation4], 1 }

</bundles_post_ra>
